<compile_context>
chip_gen: v7x
topology: tpu7x:2x2x1
jax: 0.10.0
libtpu: 0.0.40
codegen_flags: <defaults>
</compile_context>

<pallas_src>
import functools

import jax
import jax.numpy as jnp
from jax.experimental import pallas as pl
from jax.experimental.pallas import tpu as pltpu

_LANE = 512            # lane-dense last dim (multiple of 128)
_MAX_TILE_ROWS = 1024  # sublane tile; 2 MiB per f32 operand per grid step


def _masked_bce_kernel(x_ref, t_ref, o_ref, *, masked_with, rows, tile_r,
                       steps_per_core):
    c = pl.program_id(0)   # TensorCore shard ("parallel")
    i = pl.program_id(1)   # reduction step  ("arbitrary")

    @pl.when(i == 0)
    def _():
        o_ref[...] = jnp.zeros_like(o_ref)

    x = x_ref[...].astype(jnp.float32)
    t_raw = t_ref[...]
    # Compare in the target's native dtype (mirrors PyTorch's pre-cast mask).
    valid = t_raw != jnp.asarray(masked_with, dtype=t_raw.dtype)
    t = t_raw.astype(jnp.float32)

    # Mask logical rows past the real row count: tail of the last partial block
    # and the duplicated (clamped) block on the second core when nblk is odd.
    row_start = (c * steps_per_core + i) * tile_r
    row_ids = row_start + jax.lax.broadcasted_iota(jnp.int32, x.shape, 0)
    in_range = row_ids < rows

    # PyTorch F.binary_cross_entropy clamps each log term at -100.
    log_p = jnp.maximum(jnp.log(x), -100.0)
    log_1mp = jnp.maximum(jnp.log1p(-x), -100.0)
    loss = -(t * log_p + (1.0 - t) * log_1mp)
    loss = jnp.where(valid & in_range, loss, 0.0)

    # Per-lane partial sums accumulated in this core's resident output block.
    o_ref[0:1, :] += jnp.sum(loss, axis=0, keepdims=True)


@functools.partial(jax.jit, static_argnames=("masked_with",))
def masked_bce_loss(inp, target, masked_with=-1.0):
    """Pallas-TPU MaskedBCELoss.forward: sum of elementwise BCE over unmasked targets."""
    target = target.reshape(inp.shape)      # target.view(input.shape)
    x = inp.reshape(-1)                     # native dtype, no upcast in the wrapper
    t = target.reshape(-1)
    n = x.shape[0]
    if n == 0:                              # empty grid would leave the acc uninit
        return jnp.zeros((), jnp.float32)

    rem = n % _LANE
    if rem:
        # Only the sub-512 remainder is padded; padded targets carry the mask
        # value so padded lanes contribute exactly 0.
        pad = _LANE - rem
        x = jnp.pad(x, (0, pad), constant_values=0.5)
        t = jnp.pad(t, (0, pad), constant_values=float(masked_with))
    rows = x.shape[0] // _LANE
    x = x.reshape(rows, _LANE)
    t = t.reshape(rows, _LANE)

    # Block rows: either the full row extent (small inputs) or 1024 rows.
    tile_r = rows if rows < _MAX_TILE_ROWS else _MAX_TILE_ROWS
    nblk = pl.cdiv(rows, tile_r)
    spc = pl.cdiv(nblk, 2)                  # reduction steps per TensorCore

    def in_map(c, i):
        blk = c * spc + i
        if 2 * spc != nblk:                 # odd #blocks: clamp; dup block is row-masked
            blk = jnp.minimum(blk, nblk - 1)
        return (blk, 0)

    bytes_acc = int(x.size * x.dtype.itemsize
                    + t.size * t.dtype.itemsize
                    + 16 * _LANE * 4)

    partial = pl.pallas_call(
        functools.partial(_masked_bce_kernel, masked_with=float(masked_with),
                          rows=rows, tile_r=tile_r, steps_per_core=spc),
        out_shape=jax.ShapeDtypeStruct((16, _LANE), jnp.float32),
        grid=(2, spc),
        in_specs=[
            pl.BlockSpec((tile_r, _LANE), in_map),
            pl.BlockSpec((tile_r, _LANE), in_map),
        ],
        out_specs=pl.BlockSpec((8, _LANE), lambda c, i: (c, 0)),
        compiler_params=pltpu.CompilerParams(
            dimension_semantics=("parallel", "arbitrary"),
        ),
        cost_estimate=pl.CostEstimate(
            flops=8 * n, transcendentals=2 * n, bytes_accessed=bytes_acc),
    )(x, t)

    # TODO(synk): final (16, 512) lane reduction left to XLA glue (negligible work).
    return jnp.sum(partial)


if __name__ == "__main__":
    key = jax.random.PRNGKey(0)
    k1, k2, k3 = jax.random.split(key, 3)

    # input: predictions in (0,1); target has same numel but a different shape,
    # exercising target.view(input.shape); ~25% of targets masked with -1.
    inp = jax.nn.sigmoid(jax.random.normal(k1, (2, 4, 16, 16), jnp.float32))
    labels = jnp.round(jax.random.uniform(k2, (2, 4 * 16 * 16), jnp.float32))
    mask = jax.random.uniform(k3, (2, 4 * 16 * 16), jnp.float32) < 0.25
    target = jnp.where(mask, -1.0, labels)

    out = masked_bce_loss(inp, target, masked_with=-1.0)
    out = jax.block_until_ready(out)

    # Pure-JAX reference (same math as F.binary_cross_entropy + masking + sum).
    t_full = target.reshape(inp.shape)
    valid = t_full != -1.0
    ref = jnp.sum(
        jnp.where(
            valid,
            -(t_full * jnp.maximum(jnp.log(inp), -100.0)
              + (1.0 - t_full) * jnp.maximum(jnp.log1p(-inp), -100.0)),
            0.0,
        )
    )

    assert out.shape == (), out.shape
    assert bool(jnp.isfinite(out))
    assert abs(float(out) - float(ref)) <= 1e-3 * max(1.0, abs(float(ref))), (out, ref)
    print("KERNEL_OK")
</pallas_src>

<mosaic_0001>
module attributes {stable_mosaic.version = 11 : i64} {
  func.func @_masked_bce_kernel(%arg0: i32, %arg1: i32, %arg2: memref<4x512xf32, #tpu.memory_space<vmem>>, %arg3: memref<4x512xf32, #tpu.memory_space<vmem>>, %arg4: memref<8x512xf32, #tpu.memory_space<vmem>>) attributes {dimension_semantics = [#tpu.dimension_semantics<parallel>, #tpu.dimension_semantics<arbitrary>], iteration_bounds = array<i64: 2, 1>, scalar_prefetch = 0 : i64, scratch_operands = 0 : i64, tpu.core_type = #tpu.core_type<tc>, window_params = [{transform_indices = @transform_0, window_bounds = array<i64: 4, 512>}, {transform_indices = @transform_1, window_bounds = array<i64: 4, 512>}, {transform_indices = @transform_2, window_bounds = array<i64: 8, 512>}]} {
    %c0_i32 = arith.constant 0 : i32
    %0 = arith.cmpi eq, %arg1, %c0_i32 : i32
    %1 = arith.extui %0 : i1 to i32
    %c0_i32_0 = arith.constant 0 : i32
    %2 = arith.cmpi ne, %1, %c0_i32_0 : i32
    scf.if %2 {
      %cst_16 = arith.constant 0.000000e+00 : f32
      %38 = vector.broadcast %cst_16 : f32 to vector<8x512xf32>
      %c0_17 = arith.constant 0 : index
      %c0_18 = arith.constant 0 : index
      %39 = vector.load %arg4[%c0_17, %c0_18] : memref<8x512xf32, #tpu.memory_space<vmem>>, vector<8x512xf32>
      tpu.vector_store %arg4[%c0_17, %c0_18], %38 {strides = array<i32>} : memref<8x512xf32, #tpu.memory_space<vmem>>, vector<8x512xf32>,
    } else {
    }
    %c0 = arith.constant 0 : index
    %c0_1 = arith.constant 0 : index
    %3 = vector.load %arg2[%c0, %c0_1] : memref<4x512xf32, #tpu.memory_space<vmem>>, vector<4x512xf32>
    %c0_2 = arith.constant 0 : index
    %c0_3 = arith.constant 0 : index
    %4 = vector.load %arg3[%c0_2, %c0_3] : memref<4x512xf32, #tpu.memory_space<vmem>>, vector<4x512xf32>
    %cst = arith.constant -1.000000e+00 : f32
    %5 = vector.broadcast %cst : f32 to vector<4x512xf32>
    %6 = arith.cmpf one, %4, %5 : vector<4x512xf32>
    %c1_i32 = arith.constant 1 : i32
    %7 = arith.muli %arg0, %c1_i32 : i32
    %8 = arith.addi %7, %arg1 : i32
    %c4_i32 = arith.constant 4 : i32
    %9 = arith.muli %8, %c4_i32 : i32
    %10 = tpu.iota {dimensions = array<i32: 0>} : vector<4x512xi32>
    %11 = vector.broadcast %9 : i32 to vector<4x512xi32>
    %12 = arith.addi %11, %10 : vector<4x512xi32>
    %c4_i32_4 = arith.constant 4 : i32
    %13 = vector.broadcast %c4_i32_4 : i32 to vector<4x512xi32>
    %14 = arith.cmpi slt, %12, %13 : vector<4x512xi32>
    %15 = math.log %3 : vector<4x512xf32>
    %cst_5 = arith.constant -1.000000e+02 : f32
    %16 = vector.broadcast %cst_5 : f32 to vector<4x512xf32>
    %17 = arith.maximumf %15, %16 : vector<4x512xf32>
    %cst_6 = arith.constant 0.000000e+00 : f32
    %18 = vector.broadcast %cst_6 : f32 to vector<4x512xf32>
    %19 = arith.subf %18, %3 : vector<4x512xf32>
    %20 = math.log1p %19 : vector<4x512xf32>
    %cst_7 = arith.constant -1.000000e+02 : f32
    %21 = vector.broadcast %cst_7 : f32 to vector<4x512xf32>
    %22 = arith.maximumf %20, %21 : vector<4x512xf32>
    %23 = arith.mulf %4, %17 : vector<4x512xf32>
    %cst_8 = arith.constant 1.000000e+00 : f32
    %24 = vector.broadcast %cst_8 : f32 to vector<4x512xf32>
    %25 = arith.subf %24, %4 : vector<4x512xf32>
    %26 = arith.mulf %25, %22 : vector<4x512xf32>
    %27 = arith.addf %23, %26 : vector<4x512xf32>
    %cst_9 = arith.constant 0.000000e+00 : f32
    %28 = vector.broadcast %cst_9 : f32 to vector<4x512xf32>
    %29 = arith.subf %28, %27 : vector<4x512xf32>
    %30 = arith.andi %6, %14 : vector<4x512xi1>
    %cst_10 = arith.constant 0.000000e+00 : f32
    %31 = vector.broadcast %cst_10 : f32 to vector<4x512xf32>
    %32 = arith.select %30, %29, %31 : vector<4x512xi1>, vector<4x512xf32>
    %c0_11 = arith.constant 0 : index
    %c0_12 = arith.constant 0 : index
    %33 = vector.load %arg4[%c0_11, %c0_12] : memref<8x512xf32, #tpu.memory_space<vmem>>, vector<1x512xf32>
    %cst_13 = arith.constant dense<0.000000e+00> : vector<512xf32>
    %34 = vector.multi_reduction <add>, %32, %cst_13 [0] : vector<4x512xf32> to vector<512xf32>
    %35 = vector.shape_cast %34 : vector<512xf32> to vector<1x512xf32>
    %36 = arith.addf %33, %35 : vector<1x512xf32>
    %c0_14 = arith.constant 0 : index
    %c0_15 = arith.constant 0 : index
    %37 = vector.load %arg4[%c0_14, %c0_15] : memref<8x512xf32, #tpu.memory_space<vmem>>, vector<1x512xf32>
    tpu.vector_store %arg4[%c0_14, %c0_15], %36 {strides = array<i32>} : memref<8x512xf32, #tpu.memory_space<vmem>>, vector<1x512xf32>,
    return
  }
  func.func @transform_0(%arg0: i32, %arg1: i32) -> (i32, i32) {
    %c1_i32 = arith.constant 1 : i32
    %0 = arith.muli %arg0, %c1_i32 : i32
    %1 = arith.addi %0, %arg1 : i32
    %c0_i32 = arith.constant 0 : i32
    %2 = arith.minsi %1, %c0_i32 : i32
    %c0_i32_0 = arith.constant 0 : i32
    %c0_i32_1 = arith.constant 0 : i32
    return %2, %c0_i32_0 : i32, i32
  }
  func.func @transform_1(%arg0: i32, %arg1: i32) -> (i32, i32) {
    %c1_i32 = arith.constant 1 : i32
    %0 = arith.muli %arg0, %c1_i32 : i32
    %1 = arith.addi %0, %arg1 : i32
    %c0_i32 = arith.constant 0 : i32
    %2 = arith.minsi %1, %c0_i32 : i32
    %c0_i32_0 = arith.constant 0 : i32
    %c0_i32_1 = arith.constant 0 : i32
    return %2, %c0_i32_0 : i32, i32
  }
  func.func @transform_2(%arg0: i32, %arg1: i32) -> (i32, i32) {
    %c0_i32 = arith.constant 0 : i32
    %c0_i32_0 = arith.constant 0 : i32
    return %arg0, %c0_i32 : i32, i32
  }
}

</mosaic_0001>

<bundles_post_ra>
// kernel: masked_bce_loss.1
= control target key start
LH: loop header
LB: loop body
LE: loop exit
PB: predicated region body
PF: predicated region fallthrough
CT: control target
= control target key end

     0   :  { %s539_s9 = smov 0   ;;  %s541_s10 = smov 0   ;;  %s597_s0 = inlined_call_operand.vmem [shape: f32[4,512], index: 0, kind: input, shape index: {}]   ;;  %s598_s1 = inlined_call_operand.vmem [shape: f32[4,512], index: 1, kind: input, shape index: {}]   ;;  %s599_s2 = inlined_call_operand.vmem [shape: f32[16,512], index: 2, kind: output, shape index: {}]  }
   0x1   :  { %s543_s11 = smov 0  }
   0x2 LB: > { %s24_s12 = sadd.s32 1, %s514_s10  ;;  %p441_p0 = scmp.ge.s32.totalorder %s518_s11, 1  ;;  %s518_s11 = sphi %s543_s11, %s12_s11   ;;  %s514_s10 = sphi %s541_s10, %s601_s10   ;;  %s510_s9 = sphi %s539_s9, %s600_s9  }
   0x3   : > { %p26_p1 = scmp.ge.s32.totalorder %s24_s12, 2  ;;  %p158_p2 = scmp.lt.s32.totalorder %s518_s11, 3 }
   0x5   : > { %s603_s12 = smov (%p26_p1, %s24_s12), 0  ;;  %p159_p3 = pnand %p441_p0, %p158_p2 }
   0x6   : > { %p213_p4 = scmp.lt.s32.totalorder (!%p159_p3), %s510_s9, 1  ;;  %p192_p5 = scmp.lt.s32.totalorder (!%p159_p3), %s510_s9, 0  ;;  %v520_v0 = vmov (!%p159_p3), 0.0   ;;  %v234_v1 = vlaneseq (!%p159_p3)  ;;  %v521_v10 = vmov (!%p159_p3), 839922192   ;;  %v522_v27 = vmov (!%p159_p3), 0  }
   0x7   : > { %162 = sbr.rel (%p159_p3) target bundleno = 75 (0x4b), region = 28  ;;  %s454_s23 = sshll.u32 (!%p159_p3), %s510_s9, 2  ;;  %v279_v11 = vunpack.c.l.s4 (!%p159_p3), %v521_v10  ;;  %vm297_vm8 = vcmask (!%p159_p3), 1043456  }
   0x8   : > { %v577_v6 = vshrl.u32 (!%p159_p3), %v234_v1, 7  ;;  %v236_v9 = vstv (!%p159_p3), %s454_s23  ;;  %vm358_vm9 = vcmp.lt.s32.totalorder (!%p159_p3), %v234_v1, 512 }
   0x9   : > { %v280_v15 = vunpack.c.0.s8 (!%p159_p3), %v279_v11 }
   0xa   : > { %v237_v13 = vadd.s32 (!%p159_p3), %v236_v9, %v577_v6 }
   0xb   : > { %v283_v24 = vsub.s32 (!%p159_p3), %v280_v15, %v577_v6 }
   0xc   : > { %vm238_vm0 = vcmp.lt.s32.totalorder (!%p159_p3), %v237_v13, 4 }
   0xd   : > { %v277_v28 = vsel (!%p159_p3), %vm238_vm0, 1, %v522_v27 }
   0xe   : > { %s214_s13 = scalar_select %p213_p4, %s510_s9, 1  ;;  %v284_v38 = vrot.slane %v277_v28, %v283_v24 }
   0xf   : > { %s193_s14 = scalar_select %p192_p5, %s510_s9, 0 }
  0x10   : > { %s459_s15 = sshll.u32 %s214_s13, 5  ;;  %vm285_vm4 = vcmp.ne.s32.totalorder %v284_v38, 0 }
  0x11   : > { %s566_s18 = scalar_lea.vmem %s599_s2, %s459_s15  ;;  %s605_s14 = smov (!%p192_p5, %s193_s14), 0 }
  0x12   : > { %222 = vst [vmem:[%s566_s18] sm:$0xff] %v520_v0  ;;  %223 = vst [vmem:[%s566_s18 + $0x8] sm:$0xff] %v520_v0  ;;  %s457_s19 = sshll.u32 %s605_s14, 4 }
  0x13   : > { %224 = vst [vmem:[%s566_s18 + $0x10] sm:$0xff] %v520_v0  ;;  %225 = vst [vmem:[%s566_s18 + $0x18] sm:$0xff] %v520_v0  ;;  %s198_s22 = scalar_lea.vmem %s597_s0, %s457_s19  ;;  %s209_s26 = scalar_lea.vmem %s598_s1, %s457_s19 }
  0x14   : > { %v226_v2 = vld [vmem:[%s198_s22] sm:$0xff]  ;;  %v227_v3 = vld [vmem:[%s198_s22 + $0x8] sm:$0xff] }
  0x15   : > { %488 = vlog2.f32 %v226_v2  ;;  %v245_v4 = vsub.f32 0.0, %v226_v2  ;;  %v246_v5 = vsub.f32 0.0, %v227_v3  ;;  %v228_v25 = vld [vmem:[%s209_s26] sm:$0xff]  ;;  %v229_v30 = vld [vmem:[%s209_s26 + $0x8] sm:$0xff] }
  0x16   : > { %490 = vlog2.f32 %v227_v3  ;;  %v269_v37 = vsub.f32 1.0, %v228_v25  ;;  %v270_v40 = vsub.f32 1.0, %v229_v30  ;;  %vm230_vm3 = vcmp.ne.f32.partialorder %v228_v25, -1.0 }
  0x17   : > { %v247_v7 = vadd.f32 1.0, %v245_v4  ;;  %v256_v8 = vadd.f32 1.0, %v246_v5  ;;  %v250_v12 = vmul.f32 -0.5, %v245_v4  ;;  %v259_v14 = vmul.f32 -0.5, %v246_v5  ;;  %vm286_vm6 = vmand %vm230_vm3, %vm285_vm4 }
  0x18   : > { %v253_v18 = vand.u32 2147483647, %v245_v4  ;;  %v262_v22 = vand.u32 2147483647, %v246_v5  ;;  %vm231_vm5 = vcmp.ne.f32.partialorder %v229_v30, -1.0 }
  0x19   : > { %492 = vlog2.f32 %v247_v7  ;;  %v251_v16 = vadd.f32 1.0, %v250_v12  ;;  %v260_v19 = vadd.f32 1.0, %v259_v14  ;;  %vm287_vm7 = vmand %vm231_vm5, %vm285_vm4 }
  0x1a   : > { %494 = vlog2.f32 %v256_v8  ;;  %vm254_vm1 = vcmp.lt.f32.partialorder %v253_v18, 0.0004427343  ;;  %vm263_vm2 = vcmp.lt.f32.partialorder %v262_v22, 0.0004427343 }
  0x1b   : > { %v252_v26 = vmul.f32 %v251_v16, %v245_v4  ;;  %v261_v32 = vmul.f32 %v260_v19, %v246_v5  ;;  %v523_v5 = vmov 1966171168  }
  0x1c   : > { %v333_v7 = vunpack.c.l.s4 %v523_v5 }
  0x1e   : > { %v334_v16 = vunpack.c.0.s8 %v333_v7 }
  0x1f   : > { %v489_v17 = vpop.eup %488 }
  0x20   : > { %v491_v20 = vpop.eup %490  ;;  %v240_v21 = vmul.f32 0.6931472, %v489_v17  ;;  %v337_v24 = vsub.s32 %v334_v16, %v577_v6 }
  0x21   : > { %v242_v23 = vmul.f32 0.6931472, %v491_v20 }
  0x22   : > { %v243_v31 = vmax.f32 %v240_v21, -100.0 }
  0x23   : > { %v493_v29 = vpop.eup %492  ;;  %v244_v34 = vmax.f32 %v242_v23, -100.0 }
  0x24   : > { %v495_v33 = vpop.eup %494  ;;  %v249_v35 = vmul.f32 0.6931472, %v493_v29  ;;  %v267_v43 = vmul.f32 %v243_v31, %v228_v25  ;;  %v290_v31 = vld [vmem:[%s566_s18] ss:$8 sm:$0xf] }
  0x25   : > { %v258_v36 = vmul.f32 0.6931472, %v495_v33  ;;  %v268_v45 = vmul.f32 %v244_v34, %v229_v30 }
  0x26   : > { %v255_v39 = vsel %vm254_vm1, %v252_v26, %v249_v35 }
  0x27   : > { %v264_v41 = vsel %vm263_vm2, %v261_v32, %v258_v36  ;;  %v265_v42 = vmax.f32 %v255_v39, -100.0 }
  0x28   : > { %v266_v44 = vmax.f32 %v264_v41, -100.0 }
  0x29   : > { %v271_v46 = vmul.f32 %v269_v37, %v265_v42 }
  0x2a   : > { %v272_v47 = vmul.f32 %v270_v40, %v266_v44 }
  0x2b   : > { %v273_v48 = vadd.f32 %v271_v46, %v267_v43 }
  0x2c   : > { %v274_v49 = vadd.f32 %v272_v47, %v268_v45 }
  0x2d   : > { %v275_v50 = vsub.f32 0.0, %v273_v48 }
  0x2e   : > { %v276_v51 = vsub.f32 0.0, %v274_v49 }
  0x2f   : > { %v288_v52 = vsel %vm286_vm6, %v275_v50, 0.0 }
  0x30   : > { %v289_v53 = vsel %vm287_vm7, %v276_v51, 0.0  ;;  %v293_v54 = vcombine.high %v288_v52, %v288_v52  ;;  %v298_v55 = vsel %vm297_vm8, %v288_v52, 0.0 }
  0x31   : > { %v294_v56 = vcombine.high %v289_v53, %v289_v53  ;;  %v299_v57 = vrot.slane %v298_v55, 4  ;;  %v312_v58 = vsel %vm297_vm8, %v289_v53, 0.0 }
  0x32   : > { %v305_v59 = vsel %vm297_vm8, %v293_v54, 0.0  ;;  %v313_v60 = vrot.slane %v312_v58, 4 }
  0x33   : > { %v300_v61 = vadd.f32 %v299_v57, %v298_v55  ;;  %v306_v62 = vrot.slane %v305_v59, 4  ;;  %v319_v63 = vsel %vm297_vm8, %v294_v56, 0.0 }
  0x34   : > { %v314_v0 = vadd.f32 %v313_v60, %v312_v58  ;;  %v320_v2 = vrot.slane %v319_v63, 4 }
  0x35   : > { %v301_v3 = vrot.slane %v300_v61, 2  ;;  %v307_v4 = vadd.f32 %v306_v62, %v305_v59 }
  0x36   : > { %v315_v8 = vrot.slane %v314_v0, 2  ;;  %v321_v9 = vadd.f32 %v320_v2, %v319_v63 }
  0x37   : > { %v302_v10 = vadd.f32 %v301_v3, %v300_v61  ;;  %v308_v11 = vrot.slane %v307_v4, 2 }
  0x38   : > { %v316_v12 = vadd.f32 %v315_v8, %v314_v0  ;;  %v322_v13 = vrot.slane %v321_v9, 2 }
  0x39   : > { %v303_v14 = vrot.slane %v302_v10, 1  ;;  %v309_v15 = vadd.f32 %v308_v11, %v307_v4 }
  0x3a   : > { %v317_v17 = vrot.slane %v316_v12, 1  ;;  %v323_v18 = vadd.f32 %v322_v13, %v321_v9 }
  0x3b   : > { %v304_v19 = vadd.f32 %v303_v14, %v302_v10  ;;  %v310_v20 = vrot.slane %v309_v15, 1 }
  0x3c   : > { %v318_v21 = vadd.f32 %v317_v17, %v316_v12  ;;  %v324_v22 = vrot.slane %v323_v18, 1 }
  0x3d   : > { %v311_v23 = vadd.f32 %v310_v20, %v309_v15 }
  0x3e   : > { %v325_v25 = vadd.f32 %v324_v22, %v323_v18 }
  0x3f   : > { %v330_v26 = vcombine.low %v304_v19, %v311_v23 }
  0x40   : > { %v331_v27 = vcombine.low %v318_v21, %v325_v25 }
  0x41   : > { %v338_v28 = vrot.slane %v330_v26, %v337_v24 }
  0x42   : > { %v345_v29 = vrot.slane %v331_v27, %v337_v24 }
  0x44   : > { %v346_v30 = vcombine.low %v338_v28, %v345_v29 }
  0x46   : > { %v353_v32 = vrot.slane %v346_v30, %v337_v24 }
  0x48   : > { %v355_v33 = vadd.f32 %v353_v32, %v290_v31 }
  0x4a   : > { %360 = vst.msk [vmem:[%s566_s18] ss:$8 sm:$0xf] %vm358_vm9, %v355_v33 }
  0x4b PF: > { %s12_s11 = sadd.s32 1, %s518_s11   ;;  %s600_s9 = smov %s514_s10 }
  0x4c   : > { %p9_p6 = scmp.ge.s32.totalorder %s12_s11, 4   ;;  %s601_s10 = smov %s603_s12 }
  0x4e   :  { %11 = sbr.rel (!%p9_p6) target bundleno = 2 (0x2), region = 65 }

</bundles_post_ra>
